<compile_context>
chip_gen: v5e
topology: v5e:2x2
jax: 0.10.0
libtpu: 0.0.40
codegen_flags: <defaults>
</compile_context>

<pallas_src>
import jax
import jax.numpy as jnp
from jax.experimental import pallas as pl
from jax.experimental.pallas import tpu as pltpu


def _round_up(x, m):
    return ((x + m - 1) // m) * m


def _discriminator_kernel(x_ref, w1_ref, b1_ref, w2_ref, b2_ref, w3_ref, b3_ref,
                          o_ref):
    # Layer 1: (TM, D) @ (D, 256) + b1 -> ReLU.  f32 accumulation on the MXU.
    h1 = jnp.dot(x_ref[...], w1_ref[...], preferred_element_type=jnp.float32)
    h1 = jnp.maximum(h1 + b1_ref[...], 0.0)

    # Layer 2: (TM, 256) @ (256, 128) + b2 -> ReLU.
    h2 = jnp.dot(h1.astype(w2_ref.dtype), w2_ref[...],
                 preferred_element_type=jnp.float32)
    h2 = jnp.maximum(h2 + b2_ref[...], 0.0)

    # Layer 3: out_features == 1.  Keep w3 as a (1, 128) row and contract over
    # the feature axis (same contraction pattern as q @ k^T) so the result is a
    # lane-dense (1, TM) row rather than a lane-sparse (TM, 1) column.
    z = jnp.einsum("od,md->om", w3_ref[...], h2,
                   preferred_element_type=jnp.float32)        # (1, TM)
    z = z + b3_ref[0]                                         # scalar bias (SMEM)
    z = jnp.clip(z, -30.0, 30.0)                              # keep exp() finite

    # Sigmoid: exp and (approx) reciprocal both route to the EUP slot.
    sig = pl.reciprocal(1.0 + jnp.exp(-z), approx=True)
    o_ref[...] = sig.reshape(o_ref.shape).astype(o_ref.dtype)


def discriminator_forward(x, params, *, block_m=256, compute_dtype=None):
    """x: (B, input_dim) float32 -> (B, 1) float32 in [0, 1].

    block_m: batch tile (multiple of 8; 256 matches the v6e/v7x 256-wide MXU
      and is a multiple of 128 for v5e).  Batches that are not a multiple of
      the tile are zero-padded and the padding is dropped from the output.
    compute_dtype: optionally jnp.bfloat16 to feed the two big matmuls in bf16
      (f32 accumulation); default keeps everything f32.
    """
    w1, b1, w2, b2, w3, b3 = params
    B, D = x.shape
    H1 = w1.shape[1]          # 256
    H2 = w2.shape[1]          # 128

    if compute_dtype is not None:
        x = x.astype(compute_dtype)
        w1 = w1.astype(compute_dtype)
        w2 = w2.astype(compute_dtype)

    # Batch tile: multiple of 8 sublanes, clamped so tiny batches don't over-pad.
    bm = min(block_m, _round_up(B, 8))
    bm = max(8, _round_up(bm, 8))
    Bp = _round_up(B, bm)
    if Bp != B:
        x = jnp.pad(x, ((0, Bp - B), (0, 0)))
    num_tiles = Bp // bm

    bcast = lambda i: (0, 0)   # weights/biases: same (full) block every step

    out_rows = pl.pallas_call(
        _discriminator_kernel,
        out_shape=jax.ShapeDtypeStruct((num_tiles, 1, bm), jnp.float32),
        grid_spec=pltpu.PrefetchScalarGridSpec(
            num_scalar_prefetch=0,
            grid=(num_tiles,),
            in_specs=[
                pl.BlockSpec((bm, D), lambda i: (i, 0)),     # x batch tile
                pl.BlockSpec((D, H1), bcast),                # w1
                pl.BlockSpec((1, H1), bcast),                # b1
                pl.BlockSpec((H1, H2), bcast),               # w2
                pl.BlockSpec((1, H2), bcast),                # b2
                pl.BlockSpec((1, H2), bcast),                # w3 (row layout)
                pl.BlockSpec(memory_space=pltpu.MemorySpace.SMEM),  # b3 scalar
            ],
            out_specs=pl.BlockSpec((1, 1, bm), lambda i: (i, 0, 0)),
        ),
        compiler_params=pltpu.CompilerParams(
            dimension_semantics=("parallel",),   # batch tiles across TCs (v7x)
        ),
    )(x, w1, b1, w2, b2, w3, b3)

    # Lane-dense (num_tiles, 1, bm) rows -> (B, 1) column, dropping padding.
    return out_rows.reshape(-1)[:B].reshape(B, 1)


def init_discriminator_params(key, input_dim):
    """Deterministic synthetic init matching the nn.Linear shapes.

    w1/w2 are stored as (in, out) (transpose of PyTorch); w3 is kept in
    PyTorch (out=1, in=128) row layout; b3 is a scalar (shape (1,)).
    """
    k1, k2, k3 = jax.random.split(key, 3)

    def uniform(k, shape, fan_in):
        scale = 1.0 / jnp.sqrt(jnp.float32(fan_in))
        return jax.random.uniform(k, shape, jnp.float32, -scale, scale)

    w1 = uniform(k1, (input_dim, 256), input_dim)
    b1 = uniform(jax.random.fold_in(k1, 1), (1, 256), input_dim)
    w2 = uniform(k2, (256, 128), 256)
    b2 = uniform(jax.random.fold_in(k2, 1), (1, 128), 256)
    w3 = uniform(k3, (1, 128), 128)
    b3 = uniform(jax.random.fold_in(k3, 1), (1,), 128)
    return (w1, b1, w2, b2, w3, b3)


def _reference_forward(x, params):
    w1, b1, w2, b2, w3, b3 = params
    h = jnp.maximum(x @ w1 + b1, 0.0)
    h = jnp.maximum(h @ w2 + b2, 0.0)
    return jax.nn.sigmoid(h @ w3.T + b3)


if __name__ == "__main__":
    key = jax.random.PRNGKey(0)
    k_x, k_p = jax.random.split(key)

    input_dim = 32
    params = init_discriminator_params(k_p, input_dim)

    # Aligned batch: two 256-row tiles -> grid=(2,), feeds both cores on v7x.
    x = jax.random.normal(k_x, (512, input_dim), jnp.float32)
    out = jax.block_until_ready(discriminator_forward(x, params))
    ref = _reference_forward(x, params)
    assert out.shape == (512, 1)
    assert jnp.allclose(out, ref, atol=5e-3, rtol=0.0), "mismatch (aligned batch)"

    # Ragged batch: exercises the zero-padding / remainder path.
    x2 = jax.random.normal(jax.random.fold_in(k_x, 1), (100, input_dim), jnp.float32)
    out2 = jax.block_until_ready(discriminator_forward(x2, params))
    ref2 = _reference_forward(x2, params)
    assert out2.shape == (100, 1)
    assert jnp.allclose(out2, ref2, atol=5e-3, rtol=0.0), "mismatch (ragged batch)"

    print("KERNEL_OK")
</pallas_src>

<mosaic_0001>
module attributes {stable_mosaic.version = 11 : i64} {
  func.func @_discriminator_kernel(%arg0: i32, %arg1: memref<256x32xf32, #tpu.memory_space<vmem>>, %arg2: memref<32x256xf32, #tpu.memory_space<vmem>>, %arg3: memref<1x256xf32, #tpu.memory_space<vmem>>, %arg4: memref<256x128xf32, #tpu.memory_space<vmem>>, %arg5: memref<1x128xf32, #tpu.memory_space<vmem>>, %arg6: memref<1x128xf32, #tpu.memory_space<vmem>>, %arg7: memref<1xf32, #tpu.memory_space<smem>>, %arg8: memref<1x1x256xf32, #tpu.memory_space<vmem>>) attributes {dimension_semantics = [#tpu.dimension_semantics<parallel>], iteration_bounds = array<i64: 2>, scalar_prefetch = 0 : i64, scratch_operands = 0 : i64, tpu.core_type = #tpu.core_type<tc>, window_params = [{transform_indices = @transform_0, window_bounds = array<i64: 256, 32>}, {pipeline_mode = #tpu.pipeline_mode<synchronous>, transform_indices = @transform_1, window_bounds = array<i64: 32, 256>}, {pipeline_mode = #tpu.pipeline_mode<synchronous>, transform_indices = @transform_2, window_bounds = array<i64: 1, 256>}, {pipeline_mode = #tpu.pipeline_mode<synchronous>, transform_indices = @transform_3, window_bounds = array<i64: 256, 128>}, {pipeline_mode = #tpu.pipeline_mode<synchronous>, transform_indices = @transform_4, window_bounds = array<i64: 1, 128>}, {pipeline_mode = #tpu.pipeline_mode<synchronous>, transform_indices = @transform_5, window_bounds = array<i64: 1, 128>}, {transform_indices = @transform_6, window_bounds = array<i64: 1>}, {transform_indices = @transform_7, window_bounds = array<i64: 1, 1, 256>}]} {
    %c0 = arith.constant 0 : index
    %c0_0 = arith.constant 0 : index
    %0 = vector.load %arg1[%c0, %c0_0] : memref<256x32xf32, #tpu.memory_space<vmem>>, vector<256x32xf32>
    %c0_1 = arith.constant 0 : index
    %c0_2 = arith.constant 0 : index
    %1 = vector.load %arg2[%c0_1, %c0_2] : memref<32x256xf32, #tpu.memory_space<vmem>>, vector<32x256xf32>
    %cst = arith.constant dense<0.000000e+00> : vector<256x256xf32>
    %2 = tpu.matmul %0, %1, %cst {dimension_numbers = #tpu.dot_dimension_numbers<[1], [0], [0], [1], [0, 0, 1, 1], [], []>} : vector<256x32xf32>, vector<32x256xf32>, vector<256x256xf32> -> vector<256x256xf32>
    %c0_3 = arith.constant 0 : index
    %c0_4 = arith.constant 0 : index
    %3 = vector.load %arg3[%c0_3, %c0_4] : memref<1x256xf32, #tpu.memory_space<vmem>>, vector<1x256xf32>
    %4 = vector.broadcast %3 : vector<1x256xf32> to vector<256x256xf32>
    %5 = arith.addf %2, %4 : vector<256x256xf32>
    %cst_5 = arith.constant 0.000000e+00 : f32
    %6 = vector.broadcast %cst_5 : f32 to vector<256x256xf32>
    %7 = arith.maximumf %5, %6 : vector<256x256xf32>
    %c0_6 = arith.constant 0 : index
    %c0_7 = arith.constant 0 : index
    %8 = vector.load %arg4[%c0_6, %c0_7] : memref<256x128xf32, #tpu.memory_space<vmem>>, vector<256x128xf32>
    %cst_8 = arith.constant dense<0.000000e+00> : vector<256x128xf32>
    %9 = tpu.matmul %7, %8, %cst_8 {dimension_numbers = #tpu.dot_dimension_numbers<[1], [0], [0], [1], [0, 0, 1, 1], [], []>} : vector<256x256xf32>, vector<256x128xf32>, vector<256x128xf32> -> vector<256x128xf32>
    %c0_9 = arith.constant 0 : index
    %c0_10 = arith.constant 0 : index
    %10 = vector.load %arg5[%c0_9, %c0_10] : memref<1x128xf32, #tpu.memory_space<vmem>>, vector<1x128xf32>
    %11 = vector.broadcast %10 : vector<1x128xf32> to vector<256x128xf32>
    %12 = arith.addf %9, %11 : vector<256x128xf32>
    %cst_11 = arith.constant 0.000000e+00 : f32
    %13 = vector.broadcast %cst_11 : f32 to vector<256x128xf32>
    %14 = arith.maximumf %12, %13 : vector<256x128xf32>
    %c0_12 = arith.constant 0 : index
    %c0_13 = arith.constant 0 : index
    %15 = vector.load %arg6[%c0_12, %c0_13] : memref<1x128xf32, #tpu.memory_space<vmem>>, vector<1x128xf32>
    "tpu.trace_start"() <{level = 10 : i32, message = "od,md->om"}> : () -> ()
    %cst_14 = arith.constant dense<0.000000e+00> : vector<1x256xf32>
    %16 = tpu.matmul %15, %14, %cst_14 {dimension_numbers = #tpu.dot_dimension_numbers<[1], [1], [0], [0], [0, 0, 1, 0], [], []>} : vector<1x128xf32>, vector<256x128xf32>, vector<1x256xf32> -> vector<1x256xf32>
    "tpu.trace_stop"() : () -> ()
    %c0_15 = arith.constant 0 : index
    %17 = memref.load %arg7[%c0_15] : memref<1xf32, #tpu.memory_space<smem>>
    %18 = vector.broadcast %17 : f32 to vector<1x256xf32>
    %19 = arith.addf %16, %18 : vector<1x256xf32>
    %cst_16 = arith.constant -3.000000e+01 : f32
    %cst_17 = arith.constant 3.000000e+01 : f32
    %20 = vector.broadcast %cst_16 : f32 to vector<1x256xf32>
    %21 = arith.maximumf %20, %19 : vector<1x256xf32>
    %22 = vector.broadcast %cst_17 : f32 to vector<1x256xf32>
    %23 = arith.minimumf %22, %21 : vector<1x256xf32>
    %cst_18 = arith.constant 0.000000e+00 : f32
    %24 = vector.broadcast %cst_18 : f32 to vector<1x256xf32>
    %25 = arith.subf %24, %23 : vector<1x256xf32>
    %26 = math.exp %25 : vector<1x256xf32>
    %cst_19 = arith.constant 1.000000e+00 : f32
    %27 = vector.broadcast %cst_19 : f32 to vector<1x256xf32>
    %28 = arith.addf %27, %26 : vector<1x256xf32>
    %29 = tpu.reciprocal %28 {approx = true} : vector<1x256xf32> -> vector<1x256xf32>
    %30 = vector.shape_cast %29 : vector<1x256xf32> to vector<1x1x256xf32>
    %c0_20 = arith.constant 0 : index
    %c0_21 = arith.constant 0 : index
    %c0_22 = arith.constant 0 : index
    %31 = vector.load %arg8[%c0_20, %c0_21, %c0_22] : memref<1x1x256xf32, #tpu.memory_space<vmem>>, vector<1x1x256xf32>
    tpu.vector_store %arg8[%c0_20, %c0_21, %c0_22], %30 {strides = array<i32>} : memref<1x1x256xf32, #tpu.memory_space<vmem>>, vector<1x1x256xf32>,
    return
  }
  func.func @transform_0(%arg0: i32) -> (i32, i32) {
    %c0_i32 = arith.constant 0 : i32
    %c0_i32_0 = arith.constant 0 : i32
    return %arg0, %c0_i32 : i32, i32
  }
  func.func @transform_1(%arg0: i32) -> (i32, i32) {
    %c0_i32 = arith.constant 0 : i32
    %c0_i32_0 = arith.constant 0 : i32
    %c0_i32_1 = arith.constant 0 : i32
    return %c0_i32, %c0_i32_0 : i32, i32
  }
  func.func @transform_2(%arg0: i32) -> (i32, i32) {
    %c0_i32 = arith.constant 0 : i32
    %c0_i32_0 = arith.constant 0 : i32
    %c0_i32_1 = arith.constant 0 : i32
    return %c0_i32, %c0_i32_0 : i32, i32
  }
  func.func @transform_3(%arg0: i32) -> (i32, i32) {
    %c0_i32 = arith.constant 0 : i32
    %c0_i32_0 = arith.constant 0 : i32
    %c0_i32_1 = arith.constant 0 : i32
    return %c0_i32, %c0_i32_0 : i32, i32
  }
  func.func @transform_4(%arg0: i32) -> (i32, i32) {
    %c0_i32 = arith.constant 0 : i32
    %c0_i32_0 = arith.constant 0 : i32
    %c0_i32_1 = arith.constant 0 : i32
    return %c0_i32, %c0_i32_0 : i32, i32
  }
  func.func @transform_5(%arg0: i32) -> (i32, i32) {
    %c0_i32 = arith.constant 0 : i32
    %c0_i32_0 = arith.constant 0 : i32
    %c0_i32_1 = arith.constant 0 : i32
    return %c0_i32, %c0_i32_0 : i32, i32
  }
  func.func @transform_6(%arg0: i32) -> i32 {
    %c0_i32 = arith.constant 0 : i32
    %c0_i32_0 = arith.constant 0 : i32
    return %c0_i32 : i32
  }
  func.func @transform_7(%arg0: i32) -> (i32, i32, i32) {
    %c0_i32 = arith.constant 0 : i32
    %c0_i32_0 = arith.constant 0 : i32
    %c0_i32_1 = arith.constant 0 : i32
    return %arg0, %c0_i32, %c0_i32_0 : i32, i32, i32
  }
}

</mosaic_0001>

<bundles_post_ra>
// kernel: tpu_custom_call.1
= control target key start
LH: loop header
LB: loop body
LE: loop exit
PB: predicated region body
PF: predicated region fallthrough
CT: control target
= control target key end

     0   :  { %s1852_s0 = inlined_call_operand.vmem [shape: f32[512,32], index: 0, kind: input, shape index: {}]   ;;  %s1853_s1 = inlined_call_operand.vmem [shape: f32[32,256], index: 1, kind: input, shape index: {}]   ;;  %s1854_s2 = inlined_call_operand.vmem [shape: f32[1,256], index: 2, kind: input, shape index: {}]   ;;  %s1855_s3 = inlined_call_operand.vmem [shape: f32[256,128], index: 3, kind: input, shape index: {}]   ;;  %s1856_s4 = inlined_call_operand.vmem [shape: f32[1,128], index: 4, kind: input, shape index: {}]   ;;  %s1857_s5 = inlined_call_operand.vmem [shape: f32[1,128], index: 5, kind: input, shape index: {}]   ;;  %s1858_s6 = inlined_call_operand.<no memory space> [shape: f32[1], index: 6, kind: input, shape index: {}]   ;;  %s1859_s7 = inlined_call_operand.hbm [shape: f32[2,1,256], index: 7, kind: output, shape index: {}]  }
   0x1   :  { %12 = sst [smem:[#allocation2]] %s1858_s6 }
   0x2   :  { %13 = vsyncpa [#allocation4], 0 }
   0x3   :  { %15 = vsyncpa [#allocation4 + $0x1], 0  ;;  %s1382_s26 = smov 0   ;;  %s1384_s27 = smov 0  }
   0x4   :  { %s1386_s28 = smov 0   ;;  %s1388_s29 = smov 0  }
   0x5 LB: > { %s1403_s6 = sadd.s32 4294967295, %s1337_s29   ;;  %s1150_s30 = sadd.s32 4294967294, %s1337_s29   ;;  %s1337_s29 = sphi %s1388_s29, %s1865_s29   ;;  %s1333_s28 = sphi %s1386_s28, %s1864_s28   ;;  %s1329_s27 = sphi %s1384_s27, %s1863_s27   ;;  %s1325_s26 = sphi %s1382_s26, %s1862_s26  }
   0x6   : > { %s1407_s8 = sadd.s32 1, %s1337_s29   ;;  %s180_s9 = sadd.s32 1, %s1333_s28 }
   0x7   : > { %s177_s10 = ssub.s32 %s1337_s29, %s1407_s8  ;;  %p190_p0 = scmp.ne.s32.totalorder %s1333_s28, %s1329_s27 }
   0x8   : > { %p178_p1 = scmp.eq.s32.totalorder %s177_s10, 0  ;;  %p191_p2 = scmp.eq.s32.totalorder %s1403_s6, 1 }
   0x9   : > { %p196_p3 = scmp.ne.s32.totalorder %s1329_s27, %s1325_s26  ;;  %p197_p4 = scmp.eq.s32.totalorder %s1150_s30, 1 }
   0xa   : > { %s1418_s11 = scalar_select %p178_p1, %s1333_s28, %s180_s9  }
   0xb   : > { %p1420_p5 = por %p191_p2, %p190_p0  ;;  %p1424_p6 = por %p197_p4, %p196_p3 }
   0xc   : > { %p1153_p7 = scmp.ge.s32.totalorder %s1337_s29, 1  ;;  %p242_p8 = scmp.lt.s32.totalorder %s1337_s29, 3 }
   0xe   : > { %p243_p9 = pnand %p1153_p7, %p242_p8 }
   0xf   : > { %s1155_s20 = sshll.u32 (!%p243_p9), %s1403_s6, 5  ;;  %s1008_s18 = sld [smem:[#allocation2]] (!%p243_p9) }
  0x10   : > { %246 = sbr.rel (%p243_p9) target bundleno = 764 (0x2fc), region = 48  ;;  %p275_p10 = scmp.lt.s32.totalorder (!%p243_p9), %s1155_s20, 63 }
  0x11   : > { %s1224_s22 = sshll.u32 (!%p243_p9), %s1403_s6, 1  ;;  %s1295_s17 = scalar_lea.hbm (!%p243_p9), %s1859_s7, 4 }
  0x12   : > { %s1086_s25 = scalar_lea.hbm (!%p243_p9), %s1859_s7, %s1224_s22 }
  0x13   : > { %s1090_s10 = sshll.u32 (!%p243_p9), %s1086_s25, 4  ;;  %s1091_s10 = int_to_ptr.hbm [resolvable:$true] %s1090_s10 }
  0x14   : > { %s1289_s14 = sshra.s32 (!%p243_p9), %s1091_s10, 4  ;;  %s1290_s14 = int_to_ptr.hbm [resolvable:$true] %s1289_s14 }
  0x15   : > { %v318_v0 = vld [vmem:[%s1853_s1 + $0x30] sm:$0xff]  ;;  %v316_v1 = vld [vmem:[%s1853_s1 + $0x20] sm:$0xff]  ;;  %v319_v2 = vld [vmem:[%s1853_s1 + $0x38] sm:$0xff]  ;;  %s1867_s20 = smov (!%p275_p10, %s1155_s20), 63  ;;  %vm326_vm0 = vcmask 261120   ;;  %vm1067_vm1 = vcmask 1040384   ;;  %p1296_p0 = scmp.lt.s32.totalorder %s1290_s14, %s1859_s7 }
  0x16   : > { %435 = vmatpush.msra.mxu0 %v318_v0  ;;  %548 = vmatpush.msra.mxu1 %v319_v2  ;;  %v317_v3 = vld [vmem:[%s1853_s1 + $0x28] sm:$0xff]  ;;  %v314_v4 = vld [vmem:[%s1853_s1 + $0x10] sm:$0xff]  ;;  %v315_v5 = vld [vmem:[%s1853_s1 + $0x18] sm:$0xff]  ;;  %s1156_s16 = sshll.u32 %s1867_s20, 3  ;;  %s271_s20 = sand.u32 1, %s1329_s27  }
  0x17   : > { %v312_v6 = vld [vmem:[%s1853_s1] sm:$0xff]  ;;  %v313_v7 = vld [vmem:[%s1853_s1 + $0x8] sm:$0xff]  ;;  %s1458_s19 = scalar_lea.vmem %s1852_s0, %s1156_s16  ;;  %v728_v17 = vld [vmem:[%s1855_s3 + $0x78] sm:$0xff]  ;;  %s1154_s21 = sshll.u32 %s271_s20, 1 }
  0x18   : > { %436 = vmatpush.msra.mxu0 %v316_v1  ;;  %549 = vmatpush.msra.mxu1 %v317_v3  ;;  %v280_v8 = vld [vmem:[%s1458_s19] sm:$0xff]  ;;  %v281_v9 = vld [vmem:[%s1458_s19 + $0x8] sm:$0xff]  ;;  %v282_v10 = vld [vmem:[%s1458_s19 + $0x10] sm:$0xff]  ;;  %s273_s30 = scalar_lea.vmem [#allocation3], %s1154_s21  ;;  %s1076_s6 = scalar_lea.sflag [#allocation4], %s271_s20 }
  0x19   : > { %v283_v11 = vld [vmem:[%s1458_s19 + $0x18] sm:$0xff]  ;;  %v284_v12 = vld [vmem:[%s1458_s19 + $0x20] sm:$0xff]  ;;  %v285_v13 = vld [vmem:[%s1458_s19 + $0x28] sm:$0xff]  ;;  %749 = vmatpush.msra.mxu2 %v728_v17  ;;  %s1088_s9 = sshll.u32 %s273_s30, 4  ;;  %s1089_s9 = int_to_ptr.vmem [resolvable:$true] %s1088_s9 }
  0x1a   : > { %437 = vmatpush.msra.mxu0 %v314_v4  ;;  %550 = vmatpush.msra.mxu1 %v315_v5  ;;  %v286_v14 = vld [vmem:[%s1458_s19 + $0x30] sm:$0xff]  ;;  %v287_v15 = vld [vmem:[%s1458_s19 + $0x38] sm:$0xff]  ;;  %v288_v16 = vld [vmem:[%s1458_s19 + $0x40] sm:$0xff] }
  0x1b   : > { %v727_v18 = vld [vmem:[%s1855_s3 + $0x70] sm:$0xff]  ;;  %v744_v19 = vld [vmem:[%s1855_s3 + $0xf8] sm:$0xff]  ;;  %v726_v21 = vld [vmem:[%s1855_s3 + $0x68] sm:$0xff] }
  0x1c   : > { %438 = vmatpush.msra.mxu0 %v312_v6  ;;  %551 = vmatpush.msra.mxu1 %v313_v7  ;;  %v743_v20 = vld [vmem:[%s1855_s3 + $0xf0] sm:$0xff]  ;;  %v289_v22 = vld [vmem:[%s1458_s19 + $0x48] sm:$0xff]  ;;  %v725_v23 = vld [vmem:[%s1855_s3 + $0x60] sm:$0xff] }
  0x1d   : > { %1157 = vmatmul.msk.f32.vlgmr.msra.gmra.mxu0 %vm326_vm0, %v280_v8  ;;  %1189 = vmatmul.msk.f32.vlgmr.msra.gmra.mxu1 %vm326_vm0, %v280_v8  ;;  %v742_v24 = vld [vmem:[%s1855_s3 + $0xe8] sm:$0xff]  ;;  %v724_v25 = vld [vmem:[%s1855_s3 + $0x58] sm:$0xff]  ;;  %v741_v26 = vld [vmem:[%s1855_s3 + $0xe0] sm:$0xff] }
  0x1e   : > { %862 = vmatpush.msra.mxu3 %v744_v19  ;;  %750 = vmatpush.msra.mxu2 %v727_v18  ;;  %v723_v27 = vld [vmem:[%s1855_s3 + $0x50] sm:$0xff]  ;;  %v740_v28 = vld [vmem:[%s1855_s3 + $0xd8] sm:$0xff]  ;;  %v722_v29 = vld [vmem:[%s1855_s3 + $0x48] sm:$0xff] }
  0x1f   : > { %v739_v30 = vld [vmem:[%s1855_s3 + $0xd0] sm:$0xff]  ;;  %v721_v32 = vld [vmem:[%s1855_s3 + $0x40] sm:$0xff]  ;;  %v738_v33 = vld [vmem:[%s1855_s3 + $0xc8] sm:$0xff] }
  0x20   : > { %863 = vmatpush.msra.mxu3 %v743_v20  ;;  %751 = vmatpush.msra.mxu2 %v726_v21  ;;  %v290_v31 = vld [vmem:[%s1458_s19 + $0x50] sm:$0xff]  ;;  %v720_v34 = vld [vmem:[%s1855_s3 + $0x38] sm:$0xff]  ;;  %v737_v35 = vld [vmem:[%s1855_s3 + $0xc0] sm:$0xff] }
  0x21   : > { %v719_v36 = vld [vmem:[%s1855_s3 + $0x30] sm:$0xff]  ;;  %v736_v37 = vld [vmem:[%s1855_s3 + $0xb8] sm:$0xff]  ;;  %v718_v38 = vld [vmem:[%s1855_s3 + $0x28] sm:$0xff] }
  0x22   : > { %752 = vmatpush.msra.mxu2 %v725_v23  ;;  %864 = vmatpush.msra.mxu3 %v742_v24  ;;  %v735_v39 = vld [vmem:[%s1855_s3 + $0xb0] sm:$0xff]  ;;  %v291_v40 = vld [vmem:[%s1458_s19 + $0x58] sm:$0xff]  ;;  %v717_v41 = vld [vmem:[%s1855_s3 + $0x20] sm:$0xff] }
  0x23   : > { %v734_v42 = vld [vmem:[%s1855_s3 + $0xa8] sm:$0xff]  ;;  %v716_v43 = vld [vmem:[%s1855_s3 + $0x18] sm:$0xff]  ;;  %v733_v44 = vld [vmem:[%s1855_s3 + $0xa0] sm:$0xff] }
  0x24   : > { %753 = vmatpush.msra.mxu2 %v724_v25  ;;  %865 = vmatpush.msra.mxu3 %v741_v26  ;;  %v715_v45 = vld [vmem:[%s1855_s3 + $0x10] sm:$0xff]  ;;  %v732_v46 = vld [vmem:[%s1855_s3 + $0x98] sm:$0xff]  ;;  %v292_v47 = vld [vmem:[%s1458_s19 + $0x60] sm:$0xff] }
  0x25   : > { %1158 = vmatmul.msk.f32.gmra.mxu0 %vm326_vm0, %v281_v9  ;;  %1190 = vmatmul.msk.f32.gmra.mxu1 %vm326_vm0, %v281_v9  ;;  %v714_v48 = vld [vmem:[%s1855_s3 + $0x8] sm:$0xff]  ;;  %v731_v49 = vld [vmem:[%s1855_s3 + $0x90] sm:$0xff]  ;;  %v713_v50 = vld [vmem:[%s1855_s3] sm:$0xff] }
  0x26   : > { %754 = vmatpush.msra.mxu2 %v723_v27  ;;  %866 = vmatpush.msra.mxu3 %v740_v28  ;;  %v730_v51 = vld [vmem:[%s1855_s3 + $0x88] sm:$0xff]  ;;  %v729_v52 = vld [vmem:[%s1855_s3 + $0x80] sm:$0xff]  ;;  %v294_v54 = vld [vmem:[%s1458_s19 + $0x70] sm:$0xff] }
  0x27   : > { %v293_v53 = vld [vmem:[%s1458_s19 + $0x68] sm:$0xff]  ;;  %v295_v55 = vld [vmem:[%s1458_s19 + $0x78] sm:$0xff]  ;;  %v320_v56 = vld [vmem:[%s1854_s2] sm:$0x3] }
  0x28   : > { %755 = vmatpush.msra.mxu2 %v722_v29  ;;  %867 = vmatpush.msra.mxu3 %v739_v30  ;;  %v1607_v57 = vperm.slane %v320_v56, 0  ;;  %v1609_v58 = vperm.slane %v320_v56, 1  ;;  %v296_v61 = vld [vmem:[%s1458_s19 + $0x80] sm:$0xff]  ;;  %v297_v4 = vld [vmem:[%s1458_s19 + $0x88] sm:$0xff]  ;;  %v299_v18 = vld [vmem:[%s1458_s19 + $0x98] sm:$0xff] }
  0x29   : > { %v300_v25 = vld [vmem:[%s1458_s19 + $0xa0] sm:$0xff] }
  0x2a   : > { %756 = vmatpush.msra.mxu2 %v721_v32  ;;  %868 = vmatpush.msra.mxu3 %v738_v33  ;;  %v301_v32 = vld [vmem:[%s1458_s19 + $0xa8] sm:$0xff] }
  0x2c   : > { %757 = vmatpush.msra.mxu2 %v720_v34  ;;  %869 = vmatpush.msra.mxu3 %v737_v35 }
  0x2d   : > { %1159 = vmatmul.msk.f32.gmra.mxu0 %vm326_vm0, %v282_v10  ;;  %1191 = vmatmul.msk.f32.gmra.mxu1 %vm326_vm0, %v282_v10 }
  0x2e   : > { %758 = vmatpush.msra.mxu2 %v719_v36  ;;  %870 = vmatpush.msra.mxu3 %v736_v37 }
  0x30   : > { %759 = vmatpush.msra.mxu2 %v718_v38  ;;  %871 = vmatpush.msra.mxu3 %v735_v39  ;;  %v302_v39 = vld [vmem:[%s1458_s19 + $0xb0] sm:$0xff] }
  0x32   : > { %760 = vmatpush.msra.mxu2 %v717_v41  ;;  %872 = vmatpush.msra.mxu3 %v734_v42 }
  0x34   : > { %761 = vmatpush.msra.mxu2 %v716_v43  ;;  %873 = vmatpush.msra.mxu3 %v733_v44 }
  0x35   : > { %1160 = vmatmul.msk.f32.gmra.mxu0 %vm326_vm0, %v283_v11  ;;  %1192 = vmatmul.msk.f32.gmra.mxu1 %vm326_vm0, %v283_v11  ;;  %v298_v11 = vld [vmem:[%s1458_s19 + $0x90] sm:$0xff] }
  0x36   : > { %762 = vmatpush.msra.mxu2 %v715_v45  ;;  %874 = vmatpush.msra.mxu3 %v732_v46  ;;  %v303_v46 = vld [vmem:[%s1458_s19 + $0xb8] sm:$0xff] }
  0x38   : > { %763 = vmatpush.msra.mxu2 %v714_v48  ;;  %875 = vmatpush.msra.mxu3 %v731_v49 }
  0x3a   : > { %764 = vmatpush.msra.mxu2 %v713_v50  ;;  %876 = vmatpush.msra.mxu3 %v730_v51 }
  0x3c   : > { %877 = vmatpush.msra.mxu3 %v729_v52 }
  0x3d   : > { %1161 = vmatmul.msk.f32.gmra.mxu0 %vm326_vm0, %v284_v12  ;;  %1193 = vmatmul.msk.f32.gmra.mxu1 %vm326_vm0, %v284_v12 }
  0x45   : > { %1162 = vmatmul.msk.f32.gmra.mxu0 %vm326_vm0, %v285_v13  ;;  %1194 = vmatmul.msk.f32.gmra.mxu1 %vm326_vm0, %v285_v13 }
  0x4d   : > { %1163 = vmatmul.msk.f32.gmra.mxu0 %vm326_vm0, %v286_v14  ;;  %1195 = vmatmul.msk.f32.gmra.mxu1 %vm326_vm0, %v286_v14 }
  0x55   : > { %1164 = vmatmul.msk.f32.gmra.mxu0 %vm326_vm0, %v287_v15  ;;  %1196 = vmatmul.msk.f32.gmra.mxu1 %vm326_vm0, %v287_v15 }
  0x5d   : > { %1165 = vmatmul.msk.f32.gmra.mxu0 %vm326_vm0, %v288_v16  ;;  %1197 = vmatmul.msk.f32.gmra.mxu1 %vm326_vm0, %v288_v16 }
  0x65   : > { %1166 = vmatmul.msk.f32.gmra.mxu0 %vm326_vm0, %v289_v22  ;;  %1198 = vmatmul.msk.f32.gmra.mxu1 %vm326_vm0, %v289_v22 }
  0x6d   : > { %1167 = vmatmul.msk.f32.gmra.mxu0 %vm326_vm0, %v290_v31  ;;  %1199 = vmatmul.msk.f32.gmra.mxu1 %vm326_vm0, %v290_v31 }
  0x75   : > { %1168 = vmatmul.msk.f32.gmra.mxu0 %vm326_vm0, %v291_v40  ;;  %1200 = vmatmul.msk.f32.gmra.mxu1 %vm326_vm0, %v291_v40 }
  0x7d   : > { %1169 = vmatmul.msk.f32.gmra.mxu0 %vm326_vm0, %v292_v47  ;;  %1201 = vmatmul.msk.f32.gmra.mxu1 %vm326_vm0, %v292_v47 }
  0x85   : > { %1170 = vmatmul.msk.f32.gmra.mxu0 %vm326_vm0, %v293_v53  ;;  %1202 = vmatmul.msk.f32.gmra.mxu1 %vm326_vm0, %v293_v53  ;;  %v304_v53 = vld [vmem:[%s1458_s19 + $0xc0] sm:$0xff] }
  0x8d   : > { %1171 = vmatmul.msk.f32.gmra.mxu0 %vm326_vm0, %v294_v54  ;;  %1203 = vmatmul.msk.f32.gmra.mxu1 %vm326_vm0, %v294_v54 }
  0x95   : > { %1172 = vmatmul.msk.f32.gmra.mxu0 %vm326_vm0, %v295_v55  ;;  %1204 = vmatmul.msk.f32.gmra.mxu1 %vm326_vm0, %v295_v55 }
  0x9a   : > { %v440_v59 = vpop.f32.mrf.mxu0  ;;  %v553_v60 = vpop.f32.mrf.mxu1 }
  0x9b   : > { %v441_v62 = vadd.f32 %v440_v59, %v1607_v57  ;;  %v554_v63 = vadd.f32 %v553_v60, %v1609_v58 }
  0x9d   : > { %1173 = vmatmul.msk.f32.gmra.mxu0 %vm326_vm0, %v296_v61  ;;  %1205 = vmatmul.msk.f32.gmra.mxu1 %vm326_vm0, %v296_v61  ;;  %v649_v0 = vmax.f32 %v441_v62, 0.0  ;;  %v650_v1 = vmax.f32 %v554_v63, 0.0  ;;  %v305_v62 = vld [vmem:[%s1458_s19 + $0xc8] sm:$0xff] }
  0x9f   : > { %765 = vmatmul.f32.vlgmr.msra.gmra.mxu2 %v649_v0  ;;  %878 = vmatmul.f32.vlgmr.msra.gmra.mxu3 %v650_v1 }
  0xa2   : > { %v443_v2 = vpop.f32.mrf.mxu0  ;;  %v556_v3 = vpop.f32.mrf.mxu1 }
  0xa3   : > { %v444_v5 = vadd.f32 %v443_v2, %v1607_v57  ;;  %v557_v6 = vadd.f32 %v556_v3, %v1609_v58 }
  0xa5   : > { %1174 = vmatmul.msk.f32.gmra.mxu0 %vm326_vm0, %v297_v4  ;;  %1206 = vmatmul.msk.f32.gmra.mxu1 %vm326_vm0, %v297_v4  ;;  %v651_v7 = vmax.f32 %v444_v5, 0.0  ;;  %v652_v8 = vmax.f32 %v557_v6, 0.0  ;;  %v306_v5 = vld [vmem:[%s1458_s19 + $0xd0] sm:$0xff] }
  0xa7   : > { %768 = vmatmul.f32.gmra.mxu2 %v651_v7  ;;  %881 = vmatmul.f32.gmra.mxu3 %v652_v8 }
  0xaa   : > { %v446_v9 = vpop.f32.mrf.mxu0  ;;  %v559_v10 = vpop.f32.mrf.mxu1 }
  0xab   : > { %v447_v12 = vadd.f32 %v446_v9, %v1607_v57  ;;  %v560_v13 = vadd.f32 %v559_v10, %v1609_v58 }
  0xad   : > { %1175 = vmatmul.msk.f32.gmra.mxu0 %vm326_vm0, %v298_v11  ;;  %1207 = vmatmul.msk.f32.gmra.mxu1 %vm326_vm0, %v298_v11  ;;  %v653_v14 = vmax.f32 %v447_v12, 0.0  ;;  %v654_v15 = vmax.f32 %v560_v13, 0.0  ;;  %v307_v12 = vld [vmem:[%s1458_s19 + $0xd8] sm:$0xff] }
  0xaf   : > { %771 = vmatmul.f32.gmra.mxu2 %v653_v14  ;;  %884 = vmatmul.f32.gmra.mxu3 %v654_v15 }
  0xb2   : > { %v449_v16 = vpop.f32.mrf.mxu0  ;;  %v562_v17 = vpop.f32.mrf.mxu1 }
  0xb3   : > { %v450_v19 = vadd.f32 %v449_v16, %v1607_v57  ;;  %v563_v20 = vadd.f32 %v562_v17, %v1609_v58 }
  0xb5   : > { %1176 = vmatmul.msk.f32.gmra.mxu0 %vm326_vm0, %v299_v18  ;;  %1208 = vmatmul.msk.f32.gmra.mxu1 %vm326_vm0, %v299_v18  ;;  %v655_v21 = vmax.f32 %v450_v19, 0.0  ;;  %v656_v22 = vmax.f32 %v563_v20, 0.0  ;;  %v308_v19 = vld [vmem:[%s1458_s19 + $0xe0] sm:$0xff] }
  0xb7   : > { %774 = vmatmul.f32.gmra.mxu2 %v655_v21  ;;  %887 = vmatmul.f32.gmra.mxu3 %v656_v22 }
  0xba   : > { %v452_v23 = vpop.f32.mrf.mxu0  ;;  %v565_v24 = vpop.f32.mrf.mxu1 }
  0xbb   : > { %v453_v26 = vadd.f32 %v452_v23, %v1607_v57  ;;  %v566_v27 = vadd.f32 %v565_v24, %v1609_v58 }
  0xbd   : > { %1177 = vmatmul.msk.f32.gmra.mxu0 %vm326_vm0, %v300_v25  ;;  %1209 = vmatmul.msk.f32.gmra.mxu1 %vm326_vm0, %v300_v25  ;;  %v657_v28 = vmax.f32 %v453_v26, 0.0  ;;  %v658_v29 = vmax.f32 %v566_v27, 0.0  ;;  %v309_v26 = vld [vmem:[%s1458_s19 + $0xe8] sm:$0xff] }
  0xbf   : > { %777 = vmatmul.f32.gmra.mxu2 %v657_v28  ;;  %890 = vmatmul.f32.gmra.mxu3 %v658_v29 }
  0xc2   : > { %v455_v30 = vpop.f32.mrf.mxu0  ;;  %v568_v31 = vpop.f32.mrf.mxu1 }
  0xc3   : > { %v456_v33 = vadd.f32 %v455_v30, %v1607_v57  ;;  %v569_v34 = vadd.f32 %v568_v31, %v1609_v58 }
  0xc5   : > { %1178 = vmatmul.msk.f32.gmra.mxu0 %vm326_vm0, %v301_v32  ;;  %1210 = vmatmul.msk.f32.gmra.mxu1 %vm326_vm0, %v301_v32  ;;  %v659_v35 = vmax.f32 %v456_v33, 0.0  ;;  %v660_v36 = vmax.f32 %v569_v34, 0.0  ;;  %v310_v33 = vld [vmem:[%s1458_s19 + $0xf0] sm:$0xff] }
  0xc7   : > { %780 = vmatmul.f32.gmra.mxu2 %v659_v35  ;;  %893 = vmatmul.f32.gmra.mxu3 %v660_v36 }
  0xca   : > { %v458_v37 = vpop.f32.mrf.mxu0  ;;  %v571_v38 = vpop.f32.mrf.mxu1 }
  0xcb   : > { %v459_v40 = vadd.f32 %v458_v37, %v1607_v57  ;;  %v572_v41 = vadd.f32 %v571_v38, %v1609_v58 }
  0xcd   : > { %1179 = vmatmul.msk.f32.gmra.mxu0 %vm326_vm0, %v302_v39  ;;  %1211 = vmatmul.msk.f32.gmra.mxu1 %vm326_vm0, %v302_v39  ;;  %v661_v42 = vmax.f32 %v459_v40, 0.0  ;;  %v662_v43 = vmax.f32 %v572_v41, 0.0  ;;  %v311_v40 = vld [vmem:[%s1458_s19 + $0xf8] sm:$0xff]  ;;  %s1291_s19 = scalar_lea.hbm %s1290_s14, 2 }
  0xce   : > { %p1292_p11 = scmp.ne.s32.totalorder %s1290_s14, %s1291_s19  ;;  %p1297_p1 = scmp.lt.s32.totalorder %s1295_s17, %s1291_s19 }
  0xcf   : > { %783 = vmatmul.f32.gmra.mxu2 %v661_v42  ;;  %896 = vmatmul.f32.gmra.mxu3 %v662_v43 }
  0xd0   : > { %p1293_p12 = pnand %p1292_p11, %p1420_p5  ;;  %p1298_p2 = por %p1297_p1, %p1296_p0 }
  0xd2   : > { %v461_v44 = vpop.f32.mrf.mxu0  ;;  %v574_v45 = vpop.f32.mrf.mxu1  ;;  %p1294_p13 = pneg %p1293_p12 }
  0xd3   : > { %v462_v47 = vadd.f32 %v461_v44, %v1607_v57  ;;  %v575_v48 = vadd.f32 %v574_v45, %v1609_v58 }
  0xd4   : > { %p1299_p3 = pnand %p1298_p2, %p1294_p13 }
  0xd5   : > { %1180 = vmatmul.msk.f32.gmra.mxu0 %vm326_vm0, %v303_v46  ;;  %1212 = vmatmul.msk.f32.gmra.mxu1 %vm326_vm0, %v303_v46  ;;  %v663_v49 = vmax.f32 %v462_v47, 0.0  ;;  %v664_v50 = vmax.f32 %v575_v48, 0.0 }
  0xd7   : > { %786 = vmatmul.f32.gmra.mxu2 %v663_v49  ;;  %899 = vmatmul.f32.gmra.mxu3 %v664_v50 }
  0xda   : > { %v464_v51 = vpop.f32.mrf.mxu0  ;;  %v577_v52 = vpop.f32.mrf.mxu1 }
  0xdb   : > { %v465_v54 = vadd.f32 %v464_v51, %v1607_v57  ;;  %v578_v55 = vadd.f32 %v577_v52, %v1609_v58  ;;  %v1696_v51 = vld [vmem:[%s1856_s4] ss:$0 sm:$0xff] }
  0xdd   : > { %1181 = vmatmul.msk.f32.gmra.mxu0 %vm326_vm0, %v304_v53  ;;  %1213 = vmatmul.msk.f32.gmra.mxu1 %vm326_vm0, %v304_v53  ;;  %v665_v56 = vmax.f32 %v465_v54, 0.0  ;;  %v666_v59 = vmax.f32 %v578_v55, 0.0 }
  0xdf   : > { %789 = vmatmul.f32.gmra.mxu2 %v665_v56  ;;  %902 = vmatmul.f32.gmra.mxu3 %v666_v59 }
  0xe2   : > { %v467_v60 = vpop.f32.mrf.mxu0  ;;  %v580_v61 = vpop.f32.mrf.mxu1 }
  0xe3   : > { %v468_v63 = vadd.f32 %v467_v60, %v1607_v57  ;;  %v581_v0 = vadd.f32 %v580_v61, %v1609_v58 }
  0xe5   : > { %v667_v1 = vmax.f32 %v468_v63, 0.0  ;;  %v668_v2 = vmax.f32 %v581_v0, 0.0  ;;  %1182 = vmatmul.msk.f32.gmra.mxu0 %vm326_vm0, %v305_v62  ;;  %1214 = vmatmul.msk.f32.gmra.mxu1 %vm326_vm0, %v305_v62 }
  0xe7   : > { %792 = vmatmul.f32.gmra.mxu2 %v667_v1  ;;  %905 = vmatmul.f32.gmra.mxu3 %v668_v2 }
  0xea   : > { %v470_v3 = vpop.f32.mrf.mxu0  ;;  %v583_v4 = vpop.f32.mrf.mxu1 }
  0xeb   : > { %v471_v6 = vadd.f32 %v470_v3, %v1607_v57  ;;  %v584_v7 = vadd.f32 %v583_v4, %v1609_v58 }
  0xed   : > { %v669_v8 = vmax.f32 %v471_v6, 0.0  ;;  %v670_v9 = vmax.f32 %v584_v7, 0.0  ;;  %1183 = vmatmul.msk.f32.gmra.mxu0 %vm326_vm0, %v306_v5  ;;  %1215 = vmatmul.msk.f32.gmra.mxu1 %vm326_vm0, %v306_v5 }
  0xef   : > { %795 = vmatmul.f32.gmra.mxu2 %v669_v8  ;;  %908 = vmatmul.f32.gmra.mxu3 %v670_v9 }
  0xf2   : > { %v473_v10 = vpop.f32.mrf.mxu0  ;;  %v586_v11 = vpop.f32.mrf.mxu1 }
  0xf3   : > { %v474_v13 = vadd.f32 %v473_v10, %v1607_v57  ;;  %v587_v14 = vadd.f32 %v586_v11, %v1609_v58 }
  0xf5   : > { %v671_v15 = vmax.f32 %v474_v13, 0.0  ;;  %v672_v16 = vmax.f32 %v587_v14, 0.0  ;;  %1184 = vmatmul.msk.f32.gmra.mxu0 %vm326_vm0, %v307_v12  ;;  %1216 = vmatmul.msk.f32.gmra.mxu1 %vm326_vm0, %v307_v12 }
  0xf7   : > { %798 = vmatmul.f32.gmra.mxu2 %v671_v15  ;;  %911 = vmatmul.f32.gmra.mxu3 %v672_v16 }
  0xfa   : > { %v476_v17 = vpop.f32.mrf.mxu0  ;;  %v589_v18 = vpop.f32.mrf.mxu1 }
  0xfb   : > { %v477_v20 = vadd.f32 %v476_v17, %v1607_v57  ;;  %v590_v21 = vadd.f32 %v589_v18, %v1609_v58 }
  0xfd   : > { %v673_v22 = vmax.f32 %v477_v20, 0.0  ;;  %v674_v23 = vmax.f32 %v590_v21, 0.0  ;;  %1185 = vmatmul.msk.f32.gmra.mxu0 %vm326_vm0, %v308_v19  ;;  %1217 = vmatmul.msk.f32.gmra.mxu1 %vm326_vm0, %v308_v19 }
  0xff   : > { %801 = vmatmul.f32.gmra.mxu2 %v673_v22  ;;  %914 = vmatmul.f32.gmra.mxu3 %v674_v23 }
 0x102   : > { %v479_v24 = vpop.f32.mrf.mxu0  ;;  %v592_v25 = vpop.f32.mrf.mxu1 }
 0x103   : > { %v480_v27 = vadd.f32 %v479_v24, %v1607_v57  ;;  %v593_v28 = vadd.f32 %v592_v25, %v1609_v58 }
 0x105   : > { %v675_v29 = vmax.f32 %v480_v27, 0.0  ;;  %v676_v30 = vmax.f32 %v593_v28, 0.0  ;;  %1186 = vmatmul.msk.f32.gmra.mxu0 %vm326_vm0, %v309_v26  ;;  %1218 = vmatmul.msk.f32.gmra.mxu1 %vm326_vm0, %v309_v26 }
 0x107   : > { %804 = vmatmul.f32.gmra.mxu2 %v675_v29  ;;  %917 = vmatmul.f32.gmra.mxu3 %v676_v30 }
 0x10a   : > { %v482_v31 = vpop.f32.mrf.mxu0  ;;  %v595_v32 = vpop.f32.mrf.mxu1 }
 0x10b   : > { %v483_v34 = vadd.f32 %v482_v31, %v1607_v57  ;;  %v596_v35 = vadd.f32 %v595_v32, %v1609_v58 }
 0x10d   : > { %v677_v36 = vmax.f32 %v483_v34, 0.0  ;;  %v678_v37 = vmax.f32 %v596_v35, 0.0  ;;  %1187 = vmatmul.msk.f32.gmra.mxu0 %vm326_vm0, %v310_v33  ;;  %1219 = vmatmul.msk.f32.gmra.mxu1 %vm326_vm0, %v310_v33 }
 0x10f   : > { %807 = vmatmul.f32.gmra.mxu2 %v677_v36  ;;  %920 = vmatmul.f32.gmra.mxu3 %v678_v37 }
 0x112   : > { %v485_v38 = vpop.f32.mrf.mxu0  ;;  %v598_v39 = vpop.f32.mrf.mxu1 }
 0x113   : > { %v486_v41 = vadd.f32 %v485_v38, %v1607_v57  ;;  %v599_v42 = vadd.f32 %v598_v39, %v1609_v58 }
 0x115   : > { %v679_v43 = vmax.f32 %v486_v41, 0.0  ;;  %v680_v44 = vmax.f32 %v599_v42, 0.0  ;;  %1188 = vmatmul.msk.f32.gmra.mxu0 %vm326_vm0, %v311_v40  ;;  %1220 = vmatmul.msk.f32.gmra.mxu1 %vm326_vm0, %v311_v40 }
 0x117   : > { %810 = vmatmul.f32.gmra.mxu2 %v679_v43  ;;  %923 = vmatmul.f32.gmra.mxu3 %v680_v44 }
 0x11a   : > { %v488_v45 = vpop.f32.mrf.mxu0  ;;  %v601_v46 = vpop.f32.mrf.mxu1 }
 0x11b   : > { %v489_v47 = vadd.f32 %v488_v45, %v1607_v57  ;;  %v602_v48 = vadd.f32 %v601_v46, %v1609_v58 }
 0x11d   : > { %v681_v49 = vmax.f32 %v489_v47, 0.0  ;;  %v682_v50 = vmax.f32 %v602_v48, 0.0 }
 0x11f   : > { %813 = vmatmul.f32.gmra.mxu2 %v681_v49  ;;  %926 = vmatmul.f32.gmra.mxu3 %v682_v50 }
 0x122   : > { %v491_v52 = vpop.f32.mrf.mxu0  ;;  %v766_v53 = vpop.f32.mrf.mxu2 }
 0x123   : > { %v492_v54 = vadd.f32 %v491_v52, %v1607_v57  ;;  %v767_v55 = vadd.f32 %v1696_v51, %v766_v53  ;;  %v604_v56 = vpop.f32.mrf.mxu1  ;;  %v879_v59 = vpop.f32.mrf.mxu3 }
 0x124   : > { %v605_v60 = vadd.f32 %v604_v56, %v1609_v58 }
 0x125   : > { %v683_v61 = vmax.f32 %v492_v54, 0.0  ;;  %v1701_v62 = vadd.f32 %v879_v59, %v767_v55 }
 0x126   : > { %v684_v63 = vmax.f32 %v605_v60, 0.0 }
 0x127   : > { %816 = vmatmul.f32.gmra.mxu2 %v683_v61 }
 0x128   : > { %929 = vmatmul.f32.gmra.mxu3 %v684_v63 }
 0x12a   : > { %v494_v0 = vpop.f32.mrf.mxu0  ;;  %v769_v1 = vpop.f32.mrf.mxu2 }
 0x12b   : > { %v495_v2 = vadd.f32 %v494_v0, %v1607_v57  ;;  %v770_v3 = vadd.f32 %v1696_v51, %v769_v1  ;;  %v607_v4 = vpop.f32.mrf.mxu1  ;;  %v882_v5 = vpop.f32.mrf.mxu3 }
 0x12c   : > { %v608_v6 = vadd.f32 %v607_v4, %v1609_v58 }
 0x12d   : > { %v685_v7 = vmax.f32 %v495_v2, 0.0  ;;  %v1706_v8 = vadd.f32 %v882_v5, %v770_v3 }
 0x12e   : > { %v686_v9 = vmax.f32 %v608_v6, 0.0 }
 0x12f   : > { %819 = vmatmul.f32.gmra.mxu2 %v685_v7 }
 0x130   : > { %932 = vmatmul.f32.gmra.mxu3 %v686_v9 }
 0x132   : > { %v497_v10 = vpop.f32.mrf.mxu0  ;;  %v772_v11 = vpop.f32.mrf.mxu2 }
 0x133   : > { %v498_v12 = vadd.f32 %v497_v10, %v1607_v57  ;;  %v773_v13 = vadd.f32 %v1696_v51, %v772_v11  ;;  %v610_v14 = vpop.f32.mrf.mxu1  ;;  %v885_v15 = vpop.f32.mrf.mxu3 }
 0x134   : > { %v611_v16 = vadd.f32 %v610_v14, %v1609_v58 }
 0x135   : > { %v687_v17 = vmax.f32 %v498_v12, 0.0  ;;  %v1711_v18 = vadd.f32 %v885_v15, %v773_v13 }
 0x136   : > { %v688_v19 = vmax.f32 %v611_v16, 0.0 }
 0x137   : > { %822 = vmatmul.f32.gmra.mxu2 %v687_v17 }
 0x138   : > { %935 = vmatmul.f32.gmra.mxu3 %v688_v19 }
 0x13a   : > { %v500_v20 = vpop.f32.mrf.mxu0  ;;  %v775_v21 = vpop.f32.mrf.mxu2 }
 0x13b   : > { %v501_v22 = vadd.f32 %v500_v20, %v1607_v57  ;;  %v776_v23 = vadd.f32 %v1696_v51, %v775_v21  ;;  %v613_v24 = vpop.f32.mrf.mxu1  ;;  %v888_v25 = vpop.f32.mrf.mxu3 }
 0x13c   : > { %v614_v26 = vadd.f32 %v613_v24, %v1609_v58 }
 0x13d   : > { %v689_v27 = vmax.f32 %v501_v22, 0.0  ;;  %v1716_v28 = vadd.f32 %v888_v25, %v776_v23 }
 0x13e   : > { %v690_v29 = vmax.f32 %v614_v26, 0.0 }
 0x13f   : > { %825 = vmatmul.f32.gmra.mxu2 %v689_v27 }
 0x140   : > { %938 = vmatmul.f32.gmra.mxu3 %v690_v29 }
 0x142   : > { %v503_v30 = vpop.f32.mrf.mxu0  ;;  %v778_v31 = vpop.f32.mrf.mxu2 }
 0x143   : > { %v504_v32 = vadd.f32 %v503_v30, %v1607_v57  ;;  %v779_v33 = vadd.f32 %v1696_v51, %v778_v31  ;;  %v616_v34 = vpop.f32.mrf.mxu1  ;;  %v891_v35 = vpop.f32.mrf.mxu3 }
 0x144   : > { %v617_v36 = vadd.f32 %v616_v34, %v1609_v58 }
 0x145   : > { %v691_v37 = vmax.f32 %v504_v32, 0.0  ;;  %v1721_v38 = vadd.f32 %v891_v35, %v779_v33 }
 0x146   : > { %v692_v39 = vmax.f32 %v617_v36, 0.0 }
 0x147   : > { %828 = vmatmul.f32.gmra.mxu2 %v691_v37 }
 0x148   : > { %941 = vmatmul.f32.gmra.mxu3 %v692_v39 }
 0x14a   : > { %v506_v40 = vpop.f32.mrf.mxu0  ;;  %v781_v41 = vpop.f32.mrf.mxu2 }
 0x14b   : > { %v507_v42 = vadd.f32 %v506_v40, %v1607_v57  ;;  %v782_v43 = vadd.f32 %v1696_v51, %v781_v41  ;;  %v619_v44 = vpop.f32.mrf.mxu1  ;;  %v894_v45 = vpop.f32.mrf.mxu3 }
 0x14c   : > { %v620_v46 = vadd.f32 %v619_v44, %v1609_v58 }
 0x14d   : > { %v693_v47 = vmax.f32 %v507_v42, 0.0  ;;  %v1726_v48 = vadd.f32 %v894_v45, %v782_v43 }
 0x14e   : > { %v694_v49 = vmax.f32 %v620_v46, 0.0 }
 0x14f   : > { %831 = vmatmul.f32.gmra.mxu2 %v693_v47 }
 0x150   : > { %944 = vmatmul.f32.gmra.mxu3 %v694_v49 }
 0x152   : > { %v509_v50 = vpop.f32.mrf.mxu0  ;;  %v784_v52 = vpop.f32.mrf.mxu2 }
 0x153   : > { %v510_v53 = vadd.f32 %v509_v50, %v1607_v57  ;;  %v785_v54 = vadd.f32 %v1696_v51, %v784_v52  ;;  %v622_v55 = vpop.f32.mrf.mxu1  ;;  %v897_v56 = vpop.f32.mrf.mxu3 }
 0x154   : > { %v623_v59 = vadd.f32 %v622_v55, %v1609_v58 }
 0x155   : > { %v695_v60 = vmax.f32 %v510_v53, 0.0  ;;  %v1731_v61 = vadd.f32 %v897_v56, %v785_v54 }
 0x156   : > { %v696_v63 = vmax.f32 %v623_v59, 0.0 }
 0x157   : > { %834 = vmatmul.f32.gmra.mxu2 %v695_v60 }
 0x158   : > { %947 = vmatmul.f32.gmra.mxu3 %v696_v63 }
 0x15a   : > { %v512_v0 = vpop.f32.mrf.mxu0  ;;  %v787_v1 = vpop.f32.mrf.mxu2 }
 0x15b   : > { %v513_v2 = vadd.f32 %v512_v0, %v1607_v57  ;;  %v788_v3 = vadd.f32 %v1696_v51, %v787_v1  ;;  %v625_v4 = vpop.f32.mrf.mxu1  ;;  %v900_v5 = vpop.f32.mrf.mxu3 }
 0x15c   : > { %v626_v6 = vadd.f32 %v625_v4, %v1609_v58 }
 0x15d   : > { %v697_v7 = vmax.f32 %v513_v2, 0.0  ;;  %v1736_v9 = vadd.f32 %v900_v5, %v788_v3 }
 0x15e   : > { %v698_v10 = vmax.f32 %v626_v6, 0.0 }
 0x15f   : > { %837 = vmatmul.f32.gmra.mxu2 %v697_v7 }
 0x160   : > { %950 = vmatmul.f32.gmra.mxu3 %v698_v10 }
 0x162   : > { %v515_v11 = vpop.f32.mrf.mxu0  ;;  %v790_v12 = vpop.f32.mrf.mxu2 }
 0x163   : > { %v516_v13 = vadd.f32 %v515_v11, %v1607_v57  ;;  %v791_v14 = vadd.f32 %v1696_v51, %v790_v12  ;;  %v628_v15 = vpop.f32.mrf.mxu1  ;;  %v903_v16 = vpop.f32.mrf.mxu3 }
 0x164   : > { %v629_v17 = vadd.f32 %v628_v15, %v1609_v58 }
 0x165   : > { %v699_v19 = vmax.f32 %v516_v13, 0.0  ;;  %v1741_v20 = vadd.f32 %v903_v16, %v791_v14 }
 0x166   : > { %v700_v21 = vmax.f32 %v629_v17, 0.0 }
 0x167   : > { %840 = vmatmul.f32.gmra.mxu2 %v699_v19 }
 0x168   : > { %953 = vmatmul.f32.gmra.mxu3 %v700_v21 }
 0x16a   : > { %v518_v22 = vpop.f32.mrf.mxu0  ;;  %v793_v23 = vpop.f32.mrf.mxu2 }
 0x16b   : > { %v519_v24 = vadd.f32 %v518_v22, %v1607_v57  ;;  %v794_v25 = vadd.f32 %v1696_v51, %v793_v23  ;;  %v631_v26 = vpop.f32.mrf.mxu1  ;;  %v906_v27 = vpop.f32.mrf.mxu3 }
 0x16c   : > { %v632_v29 = vadd.f32 %v631_v26, %v1609_v58 }
 0x16d   : > { %v701_v30 = vmax.f32 %v519_v24, 0.0  ;;  %v1746_v31 = vadd.f32 %v906_v27, %v794_v25 }
 0x16e   : > { %v702_v32 = vmax.f32 %v632_v29, 0.0 }
 0x16f   : > { %843 = vmatmul.f32.gmra.mxu2 %v701_v30 }
 0x170   : > { %956 = vmatmul.f32.gmra.mxu3 %v702_v32 }
 0x172   : > { %v521_v33 = vpop.f32.mrf.mxu0  ;;  %v1748_v34 = vpop.f32.mrf.mxu2 }
 0x173   : > { %v522_v35 = vadd.f32 %v521_v33, %v1607_v57  ;;  %v634_v36 = vpop.f32.mrf.mxu1  ;;  %v1751_v37 = vpop.f32.mrf.mxu3 }
 0x174   : > { %v635_v39 = vadd.f32 %v634_v36, %v1609_v58 }
 0x175   : > { %v703_v40 = vmax.f32 %v522_v35, 0.0 }
 0x176   : > { %v704_v41 = vmax.f32 %v635_v39, 0.0 }
 0x177   : > { %846 = vmatmul.f32.gmra.mxu2 %v703_v40 }
 0x178   : > { %959 = vmatmul.f32.gmra.mxu3 %v704_v41 }
 0x17a   : > { %v524_v42 = vpop.f32.mrf.mxu0  ;;  %v799_v43 = vpop.f32.mrf.mxu2 }
 0x17b   : > { %v525_v44 = vadd.f32 %v524_v42, %v1607_v57  ;;  %v637_v45 = vpop.f32.mrf.mxu1  ;;  %v912_v46 = vpop.f32.mrf.mxu3  ;;  %v800_v36 = vadd.f32 %v1696_v51, %v799_v43  ;;  %v797_v42 = vadd.f32 %v1696_v51, %v1748_v34  ;;  %v984_v34 = vmax.f32 %v1746_v31, 0.0 }
 0x17c   : > { %v638_v47 = vadd.f32 %v637_v45, %v1609_v58 }
 0x17d   : > { %v705_v49 = vmax.f32 %v525_v44, 0.0  ;;  %v913_v44 = vadd.f32 %v912_v46, %v800_v36 }
 0x17e   : > { %v706_v50 = vmax.f32 %v638_v47, 0.0 }
 0x17f   : > { %849 = vmatmul.f32.gmra.mxu2 %v705_v49 }
 0x180   : > { %962 = vmatmul.f32.gmra.mxu3 %v706_v50 }
 0x182   : > { %v527_v52 = vpop.f32.mrf.mxu0  ;;  %v802_v53 = vpop.f32.mrf.mxu2 }
 0x183   : > { %v528_v54 = vadd.f32 %v527_v52, %v1607_v57  ;;  %v640_v55 = vpop.f32.mrf.mxu1  ;;  %v915_v56 = vpop.f32.mrf.mxu3  ;;  %v803_v29 = vadd.f32 %v1696_v51, %v802_v53  ;;  %v910_v52 = vadd.f32 %v1751_v37, %v797_v42  ;;  %v986_v53 = vmax.f32 %v913_v44, 0.0 }
 0x184   : > { %v641_v59 = vadd.f32 %v640_v55, %v1609_v58 }
 0x185   : > { %v707_v60 = vmax.f32 %v528_v54, 0.0  ;;  %v916_v39 = vadd.f32 %v915_v56, %v803_v29  ;;  %v985_v54 = vmax.f32 %v910_v52, 0.0 }
 0x186   : > { %v708_v63 = vmax.f32 %v641_v59, 0.0 }
 0x187   : > { %852 = vmatmul.f32.gmra.mxu2 %v707_v60  ;;  %v987_v45 = vmax.f32 %v916_v39, 0.0  ;;  %v983_v60 = vmax.f32 %v1741_v20, 0.0  ;;  %v980_v20 = vmax.f32 %v1726_v48, 0.0 }
 0x188   : > { %965 = vmatmul.f32.gmra.mxu3 %v708_v63 }
 0x18a   : > { %v530_v0 = vpop.f32.mrf.mxu0  ;;  %v805_v1 = vpop.f32.mrf.mxu2 }
 0x18b   : > { %v531_v2 = vadd.f32 %v530_v0, %v1607_v57  ;;  %v643_v3 = vpop.f32.mrf.mxu1  ;;  %v918_v4 = vpop.f32.mrf.mxu3  ;;  %v806_v25 = vadd.f32 %v1696_v51, %v805_v1  ;;  %v982_v1 = vmax.f32 %v1736_v9, 0.0 }
 0x18c   : > { %v644_v5 = vadd.f32 %v643_v3, %v1609_v58 }
 0x18d   : > { %v709_v6 = vmax.f32 %v531_v2, 0.0 }
 0x18e   : > { %v710_v7 = vmax.f32 %v644_v5, 0.0  ;;  %v981_v5 = vmax.f32 %v1731_v61, 0.0 }
 0x18f   : > { %855 = vmatmul.f32.gmra.mxu2 %v709_v6 }
 0x190   : > { %968 = vmatmul.f32.gmra.mxu3 %v710_v7 }
 0x192   : > { %v533_v10 = vpop.f32.mrf.mxu0  ;;  %v808_v11 = vpop.f32.mrf.mxu2 }
 0x193   : > { %v534_v12 = vadd.f32 %v533_v10, %v1607_v57  ;;  %v646_v13 = vpop.f32.mrf.mxu1  ;;  %v921_v14 = vpop.f32.mrf.mxu3  ;;  %v809_v21 = vadd.f32 %v1696_v51, %v808_v11  ;;  %v979_v11 = vmax.f32 %v1721_v38, 0.0 }
 0x194   : > { %v647_v15 = vadd.f32 %v646_v13, %v1609_v58  ;;  %v919_v58 = vadd.f32 %v918_v4, %v806_v25 }
 0x195   : > { %v711_v16 = vmax.f32 %v534_v12, 0.0  ;;  %v922_v26 = vadd.f32 %v921_v14, %v809_v21  ;;  %v978_v12 = vmax.f32 %v1716_v28, 0.0  ;;  %v975_v21 = vmax.f32 %v1701_v62, 0.0 }
 0x196   : > { %v712_v17 = vmax.f32 %v647_v15, 0.0  ;;  %v988_v40 = vmax.f32 %v919_v58, 0.0  ;;  %v977_v15 = vmax.f32 %v1711_v18, 0.0 }
 0x197   : > { %858 = vmatmul.f32.gmra.mxu2 %v711_v16  ;;  %v989_v30 = vmax.f32 %v922_v26, 0.0  ;;  %v976_v16 = vmax.f32 %v1706_v8, 0.0 }
 0x198   : > { %971 = vmatmul.f32.gmra.mxu3 %v712_v17 }
 0x19a   : > { %v811_v19 = vpop.f32.mrf.mxu2 }
 0x19b   : > { %v812_v22 = vadd.f32 %v1696_v51, %v811_v19  ;;  %v924_v23 = vpop.f32.mrf.mxu3 }
 0x19d   : > { %v925_v24 = vadd.f32 %v924_v23, %v812_v22 }
 0x19f   : > { %v990_v27 = vmax.f32 %v925_v24, 0.0 }
 0x1a1   : > { %1010 = vmatpush.xpose.msrb.mxu0 %v990_v27 }
 0x1a2   : > { %v814_v57 = vpop.f32.mrf.mxu2 }
 0x1a3   : > { %v815_v32 = vadd.f32 %v1696_v51, %v814_v57  ;;  %v927_v33 = vpop.f32.mrf.mxu3 }
 0x1a5   : > { %v1767_v35 = vadd.f32 %v927_v33, %v815_v32  ;;  %1011 = vmatpush.xpose.msrb.mxu0 %v989_v30 }
 0x1a9   : > { %1012 = vmatpush.xpose.msrb.mxu0 %v988_v40 }
 0x1aa   : > { %v817_v41 = vpop.f32.mrf.mxu2 }
 0x1ab   : > { %v818_v47 = vadd.f32 %v1696_v51, %v817_v41  ;;  %v930_v49 = vpop.f32.mrf.mxu3 }
 0x1ad   : > { %v1773_v50 = vadd.f32 %v930_v49, %v818_v47  ;;  %1013 = vmatpush.xpose.msrb.mxu0 %v987_v45 }
 0x1b1   : > { %1014 = vmatpush.xpose.msrb.mxu0 %v986_v53 }
 0x1b2   : > { %v820_v43 = vpop.f32.mrf.mxu2 }
 0x1b3   : > { %v821_v55 = vadd.f32 %v1696_v51, %v820_v43  ;;  %v933_v56 = vpop.f32.mrf.mxu3 }
 0x1b5   : > { %v1777_v59 = vadd.f32 %v933_v56, %v821_v55  ;;  %1015 = vmatpush.xpose.msrb.mxu0 %v985_v54 }
 0x1b9   : > { %1016 = vmatpush.xpose.msrb.mxu0 %v984_v34 }
 0x1ba   : > { %v823_v46 = vpop.f32.mrf.mxu2 }
 0x1bb   : > { %v824_v63 = vadd.f32 %v1696_v51, %v823_v46  ;;  %v936_v0 = vpop.f32.mrf.mxu3 }
 0x1bd   : > { %v1782_v37 = vadd.f32 %v936_v0, %v824_v63  ;;  %1017 = vmatpush.xpose.msrb.mxu0 %v983_v60 }
 0x1c1   : > { %1018 = vmatpush.xpose.msrb.mxu0 %v982_v1 }
 0x1c2   : > { %v826_v2 = vpop.f32.mrf.mxu2 }
 0x1c3   : > { %v827_v3 = vadd.f32 %v1696_v51, %v826_v2  ;;  %v939_v4 = vpop.f32.mrf.mxu3 }
 0x1c5   : > { %v1787_v31 = vadd.f32 %v939_v4, %v827_v3  ;;  %1019 = vmatpush.xpose.msrb.mxu0 %v981_v5 }
 0x1c9   : > { %1020 = vmatpush.xpose.msrb.mxu0 %v980_v20  ;;  %v1007_v20 = vld [vmem:[%s1857_s5] sm:$0x1] }
 0x1ca   : > { %v829_v6 = vpop.f32.mrf.mxu2 }
 0x1cb   : > { %v830_v7 = vadd.f32 %v1696_v51, %v829_v6  ;;  %v942_v10 = vpop.f32.mrf.mxu3 }
 0x1cd   : > { %v1792_v9 = vadd.f32 %v942_v10, %v830_v7  ;;  %1021 = vmatpush.xpose.msrb.mxu0 %v979_v11  ;;  %v995_v10 = vmax.f32 %v1787_v31, 0.0  ;;  %v994_v11 = vmax.f32 %v1782_v37, 0.0 }
 0x1cf   : > { %v996_v7 = vmax.f32 %v1792_v9, 0.0 }
 0x1d1   : > { %1022 = vmatpush.xpose.msrb.mxu0 %v978_v12  ;;  %v993_v12 = vmax.f32 %v1777_v59, 0.0 }
 0x1d2   : > { %v832_v13 = vpop.f32.mrf.mxu2 }
 0x1d3   : > { %v833_v61 = vadd.f32 %v1696_v51, %v832_v13  ;;  %v945_v14 = vpop.f32.mrf.mxu3  ;;  %v992_v13 = vmax.f32 %v1773_v50, 0.0 }
 0x1d5   : > { %v1797_v48 = vadd.f32 %v945_v14, %v833_v61  ;;  %1023 = vmatpush.xpose.msrb.mxu0 %v977_v15  ;;  %v991_v61 = vmax.f32 %v1767_v35, 0.0  ;;  %v1009_v14 = vstv %s1008_s18 }
 0x1d9   : > { %1024 = vmatpush.xpose.msrb.mxu0 %v976_v16 }
 0x1da   : > { %v835_v17 = vpop.f32.mrf.mxu2 }
 0x1db   : > { %v836_v38 = vadd.f32 %v1696_v51, %v835_v17  ;;  %v948_v19 = vpop.f32.mrf.mxu3 }
 0x1dd   : > { %v949_v28 = vadd.f32 %v948_v19, %v836_v38  ;;  %1025 = vmatpush.xpose.msrb.mxu0 %v975_v21 }
 0x1df   : > { %v998_v6 = vmax.f32 %v949_v28, 0.0 }
 0x1e0   : > { %1026 = vmatmul.f32.vlgmr.msrb.gmra.mxu0 %v1007_v20 }
 0x1e2   : > { %v838_v22 = vpop.f32.mrf.mxu2 }
 0x1e3   : > { %v839_v23 = vadd.f32 %v1696_v51, %v838_v22  ;;  %v951_v24 = vpop.f32.mrf.mxu3  ;;  %v1070_v22 = vlaneseq }
 0x1e5   : > { %v952_v25 = vadd.f32 %v951_v24, %v839_v23  ;;  %vm1072_vm2 = vcmp.lt.s32.totalorder %v1070_v22, 256 }
 0x1e7   : > { %v999_v5 = vmax.f32 %v952_v25, 0.0 }
 0x1ea   : > { %v841_v18 = vpop.f32.mrf.mxu2 }
 0x1eb   : > { %v842_v26 = vadd.f32 %v1696_v51, %v841_v18  ;;  %v954_v27 = vpop.f32.mrf.mxu3 }
 0x1ed   : > { %v955_v57 = vadd.f32 %v954_v27, %v842_v26 }
 0x1ef   : > { %v1000_v4 = vmax.f32 %v955_v57, 0.0 }
 0x1f2   : > { %v844_v8 = vpop.f32.mrf.mxu2 }
 0x1f3   : > { %v957_v29 = vpop.f32.mrf.mxu3  ;;  %v845_v60 = vadd.f32 %v1696_v51, %v844_v8 }
 0x1f5   : > { %v958_v1 = vadd.f32 %v957_v29, %v845_v60 }
 0x1f7   : > { %v1001_v3 = vmax.f32 %v958_v1, 0.0 }
 0x1fa   : > { %v847_v58 = vpop.f32.mrf.mxu2 }
 0x1fb   : > { %v960_v30 = vpop.f32.mrf.mxu3  ;;  %v848_v56 = vadd.f32 %v1696_v51, %v847_v58 }
 0x1fd   : > { %v961_v63 = vadd.f32 %v960_v30, %v848_v56 }
 0x1ff   : > { %v1002_v2 = vmax.f32 %v961_v63, 0.0 }
 0x202   : > { %v850_v32 = vpop.f32.mrf.mxu2 }
 0x203   : > { %v963_v33 = vpop.f32.mrf.mxu3  ;;  %v851_v43 = vadd.f32 %v1696_v51, %v850_v32 }
 0x205   : > { %v964_v34 = vadd.f32 %v963_v33, %v851_v43 }
 0x207   : > { %v1003_v0 = vmax.f32 %v964_v34, 0.0 }
 0x20a   : > { %v853_v36 = vpop.f32.mrf.mxu2 }
 0x20b   : > { %v966_v62 = vpop.f32.mrf.mxu3  ;;  %v854_v49 = vadd.f32 %v1696_v51, %v853_v36 }
 0x20d   : > { %v967_v54 = vadd.f32 %v966_v62, %v854_v49 }
 0x20f   : > { %v1004_v46 = vmax.f32 %v967_v54, 0.0 }
 0x212   : > { %v856_v39 = vpop.f32.mrf.mxu2 }
 0x213   : > { %v969_v40 = vpop.f32.mrf.mxu3  ;;  %v857_v42 = vadd.f32 %v1696_v51, %v856_v39 }
 0x215   : > { %v970_v52 = vadd.f32 %v969_v40, %v857_v42 }
 0x217   : > { %v1005_v55 = vmax.f32 %v970_v52, 0.0 }
 0x21a   : > { %v859_v41 = vpop.f32.mrf.mxu2 }
 0x21b   : > { %v860_v44 = vadd.f32 %v1696_v51, %v859_v41  ;;  %v972_v45 = vpop.f32.mrf.mxu3  ;;  %v997_v51 = vmax.f32 %v1797_v48, 0.0 }
 0x21d   : > { %v973_v47 = vadd.f32 %v972_v45, %v860_v44 }
 0x21f   : > { %v1006_v53 = vmax.f32 %v973_v47, 0.0 }
 0x221   : > { %1030 = vmatpush.xpose.msrb.mxu1 %v1006_v53 }
 0x225   : > { %1031 = vmatpush.xpose.msrb.mxu1 %v1005_v55 }
 0x229   : > { %1032 = vmatpush.xpose.msrb.mxu1 %v1004_v46 }
 0x22d   : > { %1033 = vmatpush.xpose.msrb.mxu1 %v1003_v0 }
 0x231   : > { %1034 = vmatpush.xpose.msrb.mxu1 %v1002_v2 }
 0x235   : > { %1035 = vmatpush.xpose.msrb.mxu1 %v1001_v3 }
 0x239   : > { %1036 = vmatpush.xpose.msrb.mxu1 %v1000_v4 }
 0x23d   : > { %1037 = vmatpush.xpose.msrb.mxu1 %v999_v5 }
 0x241   : > { %1038 = vmatpush.xpose.msrb.mxu1 %v998_v6 }
 0x245   : > { %1039 = vmatpush.xpose.msrb.mxu1 %v997_v51 }
 0x249   : > { %1040 = vmatpush.xpose.msrb.mxu1 %v996_v7 }
 0x24d   : > { %1041 = vmatpush.xpose.msrb.mxu1 %v995_v10 }
 0x251   : > { %1042 = vmatpush.xpose.msrb.mxu1 %v994_v11 }
 0x255   : > { %1043 = vmatpush.xpose.msrb.mxu1 %v993_v12 }
 0x259   : > { %1044 = vmatpush.xpose.msrb.mxu1 %v992_v13 }
 0x25d   : > { %1045 = vmatpush.xpose.msrb.mxu1 %v991_v61  ;;  %v1027_v9 = vpop.f32.mrf.mxu0 }
 0x25e   : > { %v1028_v15 = vadd.f32 %v1027_v9, %v1009_v14 }
 0x260   : > { %1046 = vmatmul.f32.vlgmr.msrb.gmra.mxu1 %v1007_v20  ;;  %v1221_v31 = vclamps-f32 %v1028_v15, 30.0 }
 0x262   : > { %v1054_v48 = vsub.f32 0.0, %v1221_v31 }
 0x264   : > { %v1056_v16 = vmul.f32 1.442695, %v1054_v48 }
 0x266   : > { %1267 = vpow2.f32 %v1056_v16 }
 0x26c   : > { %v1268_v19 = vpop.eup %1267 }
 0x26d   : > { %v1060_v35 = vadd.f32 1.0, %v1268_v19 }
 0x2dd   : > { %v1047_v37 = vpop.f32.mrf.mxu1 }
 0x2de   : > { %v1048_v17 = vadd.f32 %v1047_v37, %v1009_v14 }
 0x2e0   : > { %v1222_v59 = vclamps-f32 %v1048_v17, 30.0 }
 0x2e2   : > { %v1055_v38 = vsub.f32 0.0, %v1222_v59 }
 0x2e4   : > { %v1058_v50 = vmul.f32 1.442695, %v1055_v38 }
 0x2e6   : > { %1269 = vpow2.f32 %v1058_v50 }
 0x2e7   : > { %1271 = vrcp.f32 %v1060_v35 }
 0x2ec   : > { %v1270_v21 = vpop.eup %1269 }
 0x2ed   : > { %v1061_v28 = vadd.f32 1.0, %v1270_v21  ;;  %v1272_v23 = vpop.eup %1271 }
 0x2ef   : > { %1273 = vrcp.f32 %v1061_v28 }
 0x2f5   : > { %v1274_v24 = vpop.eup %1273 }
 0x2f6   : > { %v1066_v25 = vrot.slane %v1274_v24, 7 }
 0x2f8   : > { %v1068_v18 = vsel %vm1067_vm1, %v1272_v23, %v1066_v25 }
 0x2f9   : > { %1074 = vst.msk [vmem:[%s273_s30] sm:$0x3] %vm1072_vm2, %v1068_v18 }
 0x2fa   : > { %1302 = shalt.err (!%p1299_p3)
}
 0x2fb   : > { %1227 = dma.vmem_to_hbm [thread:$0]  (%p1420_p5), %s1089_s9, 32, %s1091_s10, %s1076_s6  }
 0x2fc PF: > { %p1233_p4 = scmp.ge.s32.totalorder %s1337_s29, 2  ;;  %s1102_s20 = sand.u32 1, %s1325_s26  }
 0x2fd   : > { %s1103_s22 = scalar_lea.sflag [#allocation4], %s1102_s20 }
 0x2fe   : > { %p1230_p7 = pnand %p1233_p4, %p1424_p6 }
 0x300   : > { %p1231_p8 = pneg %p1230_p7 }
 0x302   : > { %1320 = dma.done.wait (%p1231_p8), %s1103_s22, 32  }
 0x303   : > { %1322 = vsyncadd (%p1231_p8), %s1103_s22, 4294967264  ;;  %p18_p9 = scmp.ge.s32.totalorder %s1407_s8, 4   ;;  %s1862_s26 = smov %s1329_s27 }
 0x304   : > { %s1863_s27 = smov %s1333_s28  ;;  %s1864_s28 = smov %s1418_s11 }
 0x305   : > { %s1865_s29 = smov %s1407_s8  ;;  %20 = sbr.rel (!%p18_p9) target bundleno = 5 (0x5), region = 83 }
 0x30a   :  { %1109 = vsyncpa [#allocation4], 1 }
 0x30b   :  { %1111 = vsyncpa [#allocation4 + $0x1], 1 }

</bundles_post_ra>
